<compile_context>
chip_gen: v6e
topology: v6e:2x2x1
jax: 0.10.0
libtpu: 0.0.40
codegen_flags: <defaults>
</compile_context>

<pallas_src>
import math
from functools import partial

import jax
import jax.numpy as jnp
from jax.experimental import pallas as pl
from jax.experimental.pallas import tpu as pltpu


def _layernorm(x, gamma, beta, eps):
    mu = jnp.mean(x, axis=-1, keepdims=True)
    var = jnp.mean((x - mu) ** 2, axis=-1, keepdims=True)
    return (x - mu) * jax.lax.rsqrt(var + eps) * gamma + beta


def _gelu_exact(x):
    # Matches torch.nn.GELU() default (erf-based, exact).
    return 0.5 * x * (1.0 + jax.lax.erf(x * (1.0 / math.sqrt(2.0))))


# --------------------------------------------------------------------------
# Kernel 1: LayerNorm1 + fused QKV projection (lane-dense (tile, 3C) output).
# --------------------------------------------------------------------------
def qkv_kernel(x_ref, g1_ref, b1_ref, wqkv_ref, qkv_ref, *, eps):
    xf = x_ref[0].astype(jnp.float32)                              # (tr, C)
    xn = _layernorm(xf, g1_ref[0], b1_ref[0], eps)
    qkv = jnp.dot(xn.astype(jnp.bfloat16), wqkv_ref[...],
                  preferred_element_type=jnp.float32)              # (tr, 3C)
    qkv_ref[0] = qkv.astype(qkv_ref.dtype)


# --------------------------------------------------------------------------
# Kernel 2: attention (heads batched) + residual + LN2 + MLP + residual.
# --------------------------------------------------------------------------
def attn_mlp_kernel(x_ref, q_ref, k_ref, v_ref,
                    wproj_ref, bproj_ref,
                    g2_ref, b2_ref,
                    w1_ref, bf1_ref, w2_ref, bf2_ref,
                    out_ref,
                    *, num_heads, eps, kv_len):
    nh = num_heads
    x_t = x_ref[0].astype(jnp.float32)                             # (tq, C)
    q3 = q_ref[0]                                                  # (nh, tq, hd) bf16
    k3 = k_ref[0]                                                  # (nh, Np, hd) bf16
    v3 = v_ref[0]                                                  # (nh, Np, hd) bf16

    # Scores (scale already folded into the Q columns of Wqkv).
    s = jnp.einsum('hqd,hkd->hqk', q3, k3,
                   preferred_element_type=jnp.float32)             # (nh, tq, Np)
    n_pad = s.shape[-1]
    if kv_len < n_pad:  # static: mask zero-padded keys
        col = jax.lax.broadcasted_iota(jnp.int32, s.shape, 2)
        s = jnp.where(col < kv_len, s, jnp.float32(-1e30))

    s = s - jnp.max(s, axis=-1, keepdims=True)
    p = jnp.exp(s)
    denom = jnp.sum(p, axis=-1, keepdims=True)
    p = p * pl.reciprocal(denom, approx=True)                      # EUP divide

    y3 = jnp.einsum('hqk,hkd->hqd', p.astype(jnp.bfloat16), v3,
                    preferred_element_type=jnp.float32)            # (nh, tq, hd)

    # Head concat -> lane-dense (tq, C), then a single full-depth projection.
    y3b = y3.astype(jnp.bfloat16)
    y_cat = jnp.concatenate([y3b[h] for h in range(nh)], axis=-1)  # (tq, C)
    y = jnp.dot(y_cat, wproj_ref[...],
                preferred_element_type=jnp.float32) + bproj_ref[0]

    x1 = x_t + y                                                   # residual 1

    xn2 = _layernorm(x1, g2_ref[0], b2_ref[0], eps)
    h1 = jnp.dot(xn2.astype(jnp.bfloat16), w1_ref[...],
                 preferred_element_type=jnp.float32) + bf1_ref[0]  # (tq, H)
    h1 = _gelu_exact(h1)
    m = jnp.dot(h1.astype(jnp.bfloat16), w2_ref[...],
                preferred_element_type=jnp.float32) + bf2_ref[0]   # (tq, C)

    out_ref[0] = (x1 + m).astype(out_ref.dtype)                    # residual 2


# --------------------------------------------------------------------------
# Wrapper
# --------------------------------------------------------------------------
def _pad128(n):
    return -(-n // 128) * 128


def _vmem_limit_bytes(estimate):
    try:
        info = pltpu.get_tpu_info()
        cap = int(getattr(info, "vmem_capacity_bytes", 0)) or 64 * 2**20
    except Exception:
        cap = 64 * 2**20                    # conservative (v7x per-TC size)
    return int(min(max(estimate, 32 * 2**20), int(0.85 * cap)))


def vit_block(x, params, *, num_heads, eps=1e-5, tile=None):
    """x: (B, N, C) float32.  params: f32 weights already transposed for
    right-multiplication (y = x @ W).  eps=1e-5 matches nn.LayerNorm default."""
    B, N, C = x.shape
    assert C % num_heads == 0
    hd = C // num_heads
    scale = hd ** (-0.5)
    H = params["w1"].shape[1]
    f32, bf16 = jnp.float32, jnp.bfloat16

    # ---- row / query tile selection (pad N instead of collapsing the grid) --
    if tile is None:
        tile = min(N, 128)
    if tile >= N:
        tile, n_pad = N, N
    else:
        tile = max(8, (tile // 8) * 8)
        n_pad = -(-N // tile) * tile
    n_t = n_pad // tile

    x_p = x if n_pad == N else jnp.pad(x, ((0, 0), (0, n_pad - N), (0, 0)))

    # ---- weight prep (wrapper-side, zero runtime cost inside the kernels) ---
    wqkv = params["wqkv"].astype(f32)
    wqkv = wqkv.at[:, :C].multiply(scale).astype(bf16)   # fold attn scale into Q
    wproj = params["wproj"].astype(bf16)                 # plain (C, C)
    w1 = params["w1"].astype(bf16)
    w2 = params["w2"].astype(bf16)
    g1, b1 = params["g1"].astype(f32), params["b1"].astype(f32)
    g2, b2 = params["g2"].astype(f32), params["b2"].astype(f32)
    bproj = params["bproj"].astype(f32)
    bf1, bf2 = params["bf1"].astype(f32), params["bf2"].astype(f32)

    # ---- kernel 1: LN1 + QKV --------------------------------------------------
    est1 = 2 * (tile * _pad128(C) * 4 + tile * _pad128(3 * C) * 2
                + C * _pad128(3 * C) * 2 + 2 * _pad128(C) * 4) \
        + 3 * tile * _pad128(3 * C) * 4
    qkv = pl.pallas_call(
        partial(qkv_kernel, eps=eps),
        out_shape=jax.ShapeDtypeStruct((B, n_pad, 3 * C), bf16),
        grid=(B, n_t),
        in_specs=[
            pl.BlockSpec((1, tile, C), lambda b, t: (b, t, 0)),
            pl.BlockSpec((1, C), lambda b, t: (0, 0)),
            pl.BlockSpec((1, C), lambda b, t: (0, 0)),
            pl.BlockSpec((C, 3 * C), lambda b, t: (0, 0)),
        ],
        out_specs=pl.BlockSpec((1, tile, 3 * C), lambda b, t: (b, t, 0)),
        compiler_params=pltpu.CompilerParams(
            dimension_semantics=("parallel", "parallel"),
            vmem_limit_bytes=_vmem_limit_bytes(est1)),
    )(x_p, g1, b1, wqkv)

    # Head re-layout once, in XLA (layout plumbing): (3, B, nh, Np, hd) bf16.
    qkv5 = qkv.reshape(B, n_pad, 3, num_heads, hd).transpose(2, 0, 3, 1, 4)
    q, k, v = qkv5[0], qkv5[1], qkv5[2]

    # ---- kernel 2: attention + proj + residual + LN2 + MLP + residual ---------
    blk = (tile * _pad128(C) * 4
           + num_heads * tile * _pad128(hd) * 2
           + 2 * num_heads * n_pad * _pad128(hd) * 2
           + C * _pad128(C) * 2 + C * _pad128(H) * 2 + H * _pad128(C) * 2
           + 6 * _pad128(C) * 4 + _pad128(H) * 4
           + tile * _pad128(C) * 4)
    tmp = (2 * num_heads * tile * _pad128(n_pad) * 4
           + num_heads * tile * _pad128(hd) * 4
           + tile * _pad128(C) * 2 + 4 * tile * _pad128(C) * 4
           + 2 * tile * _pad128(H) * 4)
    est2 = 2 * blk + int(1.5 * tmp)

    kernel2 = partial(attn_mlp_kernel, num_heads=num_heads, eps=eps, kv_len=N)
    out = pl.pallas_call(
        kernel2,
        out_shape=jax.ShapeDtypeStruct((B, n_pad, C), x.dtype),
        grid=(B, n_t),
        in_specs=[
            pl.BlockSpec((1, tile, C), lambda b, t: (b, t, 0)),               # x
            pl.BlockSpec((1, num_heads, tile, hd), lambda b, t: (b, 0, t, 0)),  # q
            pl.BlockSpec((1, num_heads, n_pad, hd), lambda b, t: (b, 0, 0, 0)),  # k
            pl.BlockSpec((1, num_heads, n_pad, hd), lambda b, t: (b, 0, 0, 0)),  # v
            pl.BlockSpec((C, C), lambda b, t: (0, 0)),                        # wproj
            pl.BlockSpec((1, C), lambda b, t: (0, 0)),                        # bproj
            pl.BlockSpec((1, C), lambda b, t: (0, 0)),                        # g2
            pl.BlockSpec((1, C), lambda b, t: (0, 0)),                        # b2
            pl.BlockSpec((C, H), lambda b, t: (0, 0)),                        # w1
            pl.BlockSpec((1, H), lambda b, t: (0, 0)),                        # bf1
            pl.BlockSpec((H, C), lambda b, t: (0, 0)),                        # w2
            pl.BlockSpec((1, C), lambda b, t: (0, 0)),                        # bf2
        ],
        out_specs=pl.BlockSpec((1, tile, C), lambda b, t: (b, t, 0)),
        compiler_params=pltpu.CompilerParams(
            dimension_semantics=("parallel", "parallel"),
            vmem_limit_bytes=_vmem_limit_bytes(est2)),
    )(x_p, q, k, v, wproj, bproj, g2, b2, w1, bf1, w2, bf2)

    if n_pad != N:
        out = out[:, :N, :]
    return out

# TODO(synk): for very long sequences (N >~ 1k) the attention should be tiled
# over K/V chunks with an online-softmax accumulator instead of materializing
# the full (nh, tq, N) score tensor per query tile.


# ---------------------------------------------------------------------------
# Pure-JAX f32 reference (mirrors the PyTorch forward) for correctness check.
# ---------------------------------------------------------------------------
def vit_block_ref(x, params, *, num_heads, eps=1e-5):
    B, N, C = x.shape
    hd = C // num_heads
    scale = hd ** (-0.5)

    def ln(v, g, b):
        mu = jnp.mean(v, axis=-1, keepdims=True)
        var = jnp.mean((v - mu) ** 2, axis=-1, keepdims=True)
        return (v - mu) / jnp.sqrt(var + eps) * g + b

    xn = ln(x, params["g1"][0], params["b1"][0])
    qkv = xn @ params["wqkv"]
    qkv = qkv.reshape(B, N, 3, num_heads, hd).transpose(2, 0, 3, 1, 4)
    q, k, v = qkv[0], qkv[1], qkv[2]
    attn = jnp.einsum("bhqd,bhkd->bhqk", q, k) * scale
    attn = jax.nn.softmax(attn, axis=-1)
    y = jnp.einsum("bhqk,bhkd->bhqd", attn, v)
    y = y.transpose(0, 2, 1, 3).reshape(B, N, C)
    y = y @ params["wproj"] + params["bproj"][0]
    x = x + y
    xn2 = ln(x, params["g2"][0], params["b2"][0])
    h = xn2 @ params["w1"] + params["bf1"][0]
    h = 0.5 * h * (1.0 + jax.lax.erf(h / math.sqrt(2.0)))
    h = h @ params["w2"] + params["bf2"][0]
    return x + h


if __name__ == "__main__":
    B, N, C = 2, 16, 128          # C lane-aligned; small shapes for the check
    num_heads = 4
    H = int(C * 4.0)

    key = jax.random.PRNGKey(0)
    keys = jax.random.split(key, 12)

    params = {
        "g1": 1.0 + 0.1 * jax.random.normal(keys[8], (1, C), jnp.float32),
        "b1": 0.02 * jax.random.normal(keys[9], (1, C), jnp.float32),
        # qkv_bias=False in Block defaults -> no qkv bias.
        "wqkv": 0.02 * jax.random.normal(keys[0], (C, 3 * C), jnp.float32),
        "wproj": 0.02 * jax.random.normal(keys[1], (C, C), jnp.float32),
        "bproj": 0.02 * jax.random.normal(keys[2], (1, C), jnp.float32),
        "g2": 1.0 + 0.1 * jax.random.normal(keys[10], (1, C), jnp.float32),
        "b2": 0.02 * jax.random.normal(keys[11], (1, C), jnp.float32),
        "w1": 0.02 * jax.random.normal(keys[3], (C, H), jnp.float32),
        "bf1": 0.02 * jax.random.normal(keys[4], (1, H), jnp.float32),
        "w2": 0.02 * jax.random.normal(keys[5], (H, C), jnp.float32),
        "bf2": 0.02 * jax.random.normal(keys[6], (1, C), jnp.float32),
    }

    x = jax.random.normal(keys[7], (B, N, C), jnp.float32)

    out = jax.block_until_ready(vit_block(x, params, num_heads=num_heads))
    ref = vit_block_ref(x, params, num_heads=num_heads)

    assert out.shape == (B, N, C)
    err = float(jnp.max(jnp.abs(out - ref)))
    assert err < 2e-2, f"max abs err {err}"   # bf16 MXU inputs vs f32 reference
    print("KERNEL_OK")
</pallas_src>

<mosaic_0001>
module attributes {stable_mosaic.version = 11 : i64} {
  func.func @qkv_kernel(%arg0: i32, %arg1: i32, %arg2: memref<1x16x128xf32, #tpu.memory_space<vmem>>, %arg3: memref<1x128xf32, #tpu.memory_space<vmem>>, %arg4: memref<1x128xf32, #tpu.memory_space<vmem>>, %arg5: memref<128x384xbf16, #tpu.memory_space<vmem>>, %arg6: memref<1x16x384xbf16, #tpu.memory_space<vmem>>) attributes {dimension_semantics = [#tpu.dimension_semantics<parallel>, #tpu.dimension_semantics<parallel>], iteration_bounds = array<i64: 2, 1>, scalar_prefetch = 0 : i64, scratch_operands = 0 : i64, tpu.core_type = #tpu.core_type<tc>, window_params = [{transform_indices = @transform_0, window_bounds = array<i64: 1, 16, 128>}, {pipeline_mode = #tpu.pipeline_mode<synchronous>, transform_indices = @transform_1, window_bounds = array<i64: 1, 128>}, {pipeline_mode = #tpu.pipeline_mode<synchronous>, transform_indices = @transform_2, window_bounds = array<i64: 1, 128>}, {pipeline_mode = #tpu.pipeline_mode<synchronous>, transform_indices = @transform_3, window_bounds = array<i64: 128, 384>}, {transform_indices = @transform_4, window_bounds = array<i64: 1, 16, 384>}]} {
    %c0 = arith.constant 0 : index
    %c0_0 = arith.constant 0 : index
    %c0_1 = arith.constant 0 : index
    %0 = vector.load %arg2[%c0, %c0_0, %c0_1] : memref<1x16x128xf32, #tpu.memory_space<vmem>>, vector<1x16x128xf32>
    %1 = vector.shape_cast %0 : vector<1x16x128xf32> to vector<16x128xf32>
    %c0_2 = arith.constant 0 : index
    %c0_3 = arith.constant 0 : index
    %2 = vector.load %arg3[%c0_2, %c0_3] : memref<1x128xf32, #tpu.memory_space<vmem>>, vector<1x128xf32>
    %3 = vector.shape_cast %2 : vector<1x128xf32> to vector<128xf32>
    %c0_4 = arith.constant 0 : index
    %c0_5 = arith.constant 0 : index
    %4 = vector.load %arg4[%c0_4, %c0_5] : memref<1x128xf32, #tpu.memory_space<vmem>>, vector<1x128xf32>
    %5 = vector.shape_cast %4 : vector<1x128xf32> to vector<128xf32>
    %cst = arith.constant dense<0.000000e+00> : vector<16xf32>
    %6 = vector.multi_reduction <add>, %1, %cst [1] : vector<16x128xf32> to vector<16xf32>
    %7 = vector.shape_cast %6 : vector<16xf32> to vector<16x1xf32>
    %cst_6 = arith.constant 1.280000e+02 : f32
    %8 = vector.broadcast %cst_6 : f32 to vector<16x1xf32>
    %9 = arith.divf %7, %8 : vector<16x1xf32>
    %10 = vector.broadcast %9 : vector<16x1xf32> to vector<16x128xf32>
    %11 = arith.subf %1, %10 : vector<16x128xf32>
    %12 = arith.mulf %11, %11 : vector<16x128xf32>
    %cst_7 = arith.constant dense<0.000000e+00> : vector<16xf32>
    %13 = vector.multi_reduction <add>, %12, %cst_7 [1] : vector<16x128xf32> to vector<16xf32>
    %14 = vector.shape_cast %13 : vector<16xf32> to vector<16x1xf32>
    %cst_8 = arith.constant 1.280000e+02 : f32
    %15 = vector.broadcast %cst_8 : f32 to vector<16x1xf32>
    %16 = arith.divf %14, %15 : vector<16x1xf32>
    %17 = vector.broadcast %9 : vector<16x1xf32> to vector<16x128xf32>
    %18 = arith.subf %1, %17 : vector<16x128xf32>
    %cst_9 = arith.constant 9.99999974E-6 : f32
    %19 = vector.broadcast %cst_9 : f32 to vector<16x1xf32>
    %20 = arith.addf %16, %19 : vector<16x1xf32>
    %21 = math.rsqrt %20 : vector<16x1xf32>
    %22 = vector.broadcast %21 : vector<16x1xf32> to vector<16x128xf32>
    %23 = arith.mulf %18, %22 : vector<16x128xf32>
    %24 = vector.shape_cast %3 : vector<128xf32> to vector<1x128xf32>
    %25 = vector.broadcast %24 : vector<1x128xf32> to vector<16x128xf32>
    %26 = arith.mulf %23, %25 : vector<16x128xf32>
    %27 = vector.shape_cast %5 : vector<128xf32> to vector<1x128xf32>
    %28 = vector.broadcast %27 : vector<1x128xf32> to vector<16x128xf32>
    %29 = arith.addf %26, %28 : vector<16x128xf32>
    %30 = arith.truncf %29 : vector<16x128xf32> to vector<16x128xbf16>
    %c0_10 = arith.constant 0 : index
    %c0_11 = arith.constant 0 : index
    %31 = vector.load %arg5[%c0_10, %c0_11] : memref<128x384xbf16, #tpu.memory_space<vmem>>, vector<128x384xbf16>
    %cst_12 = arith.constant dense<0.000000e+00> : vector<16x384xf32>
    %32 = tpu.matmul %30, %31, %cst_12 {dimension_numbers = #tpu.dot_dimension_numbers<[1], [0], [0], [1], [0, 0, 1, 1], [], []>} : vector<16x128xbf16>, vector<128x384xbf16>, vector<16x384xf32> -> vector<16x384xf32>
    %33 = arith.truncf %32 : vector<16x384xf32> to vector<16x384xbf16>
    %c0_13 = arith.constant 0 : index
    %c0_14 = arith.constant 0 : index
    %c0_15 = arith.constant 0 : index
    %34 = vector.load %arg6[%c0_13, %c0_14, %c0_15] : memref<1x16x384xbf16, #tpu.memory_space<vmem>>, vector<1x16x384xbf16>
    %35 = vector.shape_cast %34 : vector<1x16x384xbf16> to vector<16x384xbf16>
    %36 = vector.shape_cast %33 : vector<16x384xbf16> to vector<1x16x384xbf16>
    tpu.vector_store %arg6[%c0_13, %c0_14, %c0_15], %36 {strides = array<i32>} : memref<1x16x384xbf16, #tpu.memory_space<vmem>>, vector<1x16x384xbf16>,
    return
  }
  func.func @transform_0(%arg0: i32, %arg1: i32) -> (i32, i32, i32) {
    %c0_i32 = arith.constant 0 : i32
    %c0_i32_0 = arith.constant 0 : i32
    return %arg0, %arg1, %c0_i32 : i32, i32, i32
  }
  func.func @transform_1(%arg0: i32, %arg1: i32) -> (i32, i32) {
    %c0_i32 = arith.constant 0 : i32
    %c0_i32_0 = arith.constant 0 : i32
    %c0_i32_1 = arith.constant 0 : i32
    return %c0_i32, %c0_i32_0 : i32, i32
  }
  func.func @transform_2(%arg0: i32, %arg1: i32) -> (i32, i32) {
    %c0_i32 = arith.constant 0 : i32
    %c0_i32_0 = arith.constant 0 : i32
    %c0_i32_1 = arith.constant 0 : i32
    return %c0_i32, %c0_i32_0 : i32, i32
  }
  func.func @transform_3(%arg0: i32, %arg1: i32) -> (i32, i32) {
    %c0_i32 = arith.constant 0 : i32
    %c0_i32_0 = arith.constant 0 : i32
    %c0_i32_1 = arith.constant 0 : i32
    return %c0_i32, %c0_i32_0 : i32, i32
  }
  func.func @transform_4(%arg0: i32, %arg1: i32) -> (i32, i32, i32) {
    %c0_i32 = arith.constant 0 : i32
    %c0_i32_0 = arith.constant 0 : i32
    return %arg0, %arg1, %c0_i32 : i32, i32, i32
  }
}

</mosaic_0001>

<bundles_post_ra>
// kernel: tpu_custom_call.1
= control target key start
LH: loop header
LB: loop body
LE: loop exit
PB: predicated region body
PF: predicated region fallthrough
CT: control target
= control target key end

     0   :  { %s1260_s0 = inlined_call_operand.hbm [shape: f32[2,16,128], index: 0, kind: input, shape index: {}]   ;;  %s1261_s1 = inlined_call_operand.vmem [shape: f32[1,128], index: 1, kind: input, shape index: {}]   ;;  %s1262_s2 = inlined_call_operand.vmem [shape: f32[1,128], index: 2, kind: input, shape index: {}]   ;;  %s1263_s3 = inlined_call_operand.hbm [shape: bf16[128,384], index: 3, kind: input, shape index: {}]   ;;  %s1264_s4 = inlined_call_operand.hbm [shape: bf16[2,16,384], index: 4, kind: output, shape index: {}]  }
   0x1   :  { %1266 = sst [smem:[#allocation11_spill]] %s1263_s3 }
   0x2   :  { %9 = vsyncpa [#allocation3], 0 }
   0x3   :  { %11 = vsyncpa [#allocation3 + $0x1], 0 }
   0x4   :  { %12 = vsyncpa [#allocation6], 0 }
   0x5   :  { %13 = vsyncpa [#allocation4], 0 }
   0x6   :  { %15 = vsyncpa [#allocation4 + $0x1], 0  ;;  %s1053_s15 = smov 0   ;;  %s1055_s16 = smov 0  }
   0x7   :  { %s1057_s17 = smov 0   ;;  %s1059_s18 = smov 0  }
   0x8   :  { %s1061_s19 = smov 0   ;;  %s1063_s20 = smov 0  }
   0x9 LB: > { %s678_s21 = sadd.s32 4294967295, %s1014_s20   ;;  %s679_s22 = sadd.s32 4294967294, %s1014_s20   ;;  %s1014_s20 = sphi %s1063_s20, %s21_s20   ;;  %s1010_s19 = sphi %s1061_s19, %s1284_s19   ;;  %s1006_s18 = sphi %s1059_s18, %s1283_s18   ;;  %s1002_s17 = sphi %s1057_s17, %s1282_s17   ;;  %s998_s16 = sphi %s1055_s16, %s1281_s16   ;;  %s994_s15 = sphi %s1053_s15, %s1280_s15  }
   0xa   : > { %p55_p0 = scmp.ne.s32.totalorder %s998_s16, %s994_s15  ;;  %p1087_p1 = scmp.eq.s32.totalorder %s678_s21, 0 }
   0xb   : > { %p1091_p2 = scmp.eq.s32.totalorder %s678_s21, 1  ;;  %p150_p3 = scmp.eq.s32.totalorder %s679_s22, 1 }
   0xc   : > { %p1097_p4 = por %p1087_p1, %p55_p0  ;;  %p680_p5 = scmp.ge.s32.totalorder %s1014_s20, 1 }
   0xd   : > { %p1102_p6 = por %p150_p3, %p55_p0  ;;  %p157_p7 = scmp.lt.s32.totalorder %s1014_s20, 3 }
   0xe   : > { %s1269_s25 = scalar_select %p1097_p4, 1, 0 }
   0xf   : > { %s1270_s26 = scalar_select %p1102_p6, 1, 0 }
  0x10   : > { %p1107_p8 = pnand %p680_p5, %p157_p7  ;;  %s1016_s28 = smov [#allocation5]  }
  0x11   : > { %s175_s29 = sshll.u32 %s1016_s28, 4  ;;  %s33_s5 = sadd.s32 1, %s1010_s19  ;;  %s176_s29 = int_to_ptr.vmem [resolvable:$true] %s175_s29 }
  0x12   : > { %p766_p9 = pneg %p1107_p8  ;;  %s887_s6 = scalar_lea.vmem %s176_s29, 3072 }
  0x13   : > { %p888_p13 = scmp.ne.s32.totalorder %s176_s29, %s887_s6  ;;  %p895_p5 = scmp.lt.s32.totalorder %s176_s29, %s176_s29 }
  0x14   : > { %p1116_p11 = pnand %p766_p9, %p1087_p1  ;;  %p896_p7 = scmp.lt.s32.totalorder %s887_s6, %s887_s6 }
  0x16   : > { %p878_p12 = pneg %p1116_p11  ;;  %p897_p6 = por %p896_p7, %p895_p5 }
  0x18   : > { %p890_p0 = pnand %p888_p13, %p878_p12 }
  0x1a   : > { %p891_p3 = pneg %p890_p0 }
  0x1c   : > { %p898_p4 = pnand %p897_p6, %p891_p3 }
  0x1e   : > { %901 = shalt.err (!%p898_p4)
}
  0x1f   : > { %s1017_s7 = smov 192   ;;  %s1018_s8 = smov 12  }
  0x20   : > { %s1273_s3 = sld [smem:[#allocation11_spill]]  ;;  %p35_p6 = scmp.ge.s32.totalorder %s33_s5, 2 }
  0x21   : > { %s42_s11 = sadd.s32 1, %s1002_s17  ;;  %p49_p4 = scmp.ne.s32.totalorder %s1002_s17, %s998_s16 }
  0x22   : > { %p50_p9 = scmp.eq.s32.totalorder %s1014_s20, 0  ;;  %s1286_s5 = smov (%p35_p6, %s33_s5), 0 }
  0x23   : > { %p1140_p13 = por %p1091_p2, %p49_p4  ;;  %s37_s14 = ssub.s32 %s1010_s19, %s1286_s5 }
  0x24   : > { %p1134_p12 = por %p50_p9, %p49_p4  ;;  %p779_p0 = scmp.lt.s32.totalorder %s1014_s20, 2 }
  0x25   : > { %s189_s21 = sand.u32 1, %s1002_s17  }
  0x26   : > { %769 = dma.hbm_to_vmem [thread:$0]  (!%p1116_p11), %s1273_s3, 3072, %s176_s29, [#allocation6], %s1017_s7, %s1017_s7, %s1018_s8  }
  0x27   : > { %p40_p11 = scmp.eq.s32.totalorder %s37_s14, 0  ;;  %s683_s22 = sshll.u32 %s189_s21, 4 }
  0x28   : > { %s722_s29 = sshll.u32 %s1010_s19, 8  ;;  %s193_s8 = scalar_lea.vmem [#allocation2], %s683_s22 }
  0x29   : > { %s1149_s28 = scalar_select %p40_p11, %s1002_s17, %s42_s11  }
  0x2a   : > { %s201_s7 = scalar_lea.hbm %s1260_s0, %s722_s29  ;;  %s202_s9 = sshll.u32 %s193_s8, 4  ;;  %s203_s9 = int_to_ptr.vmem [resolvable:$true] %s202_s9 }
  0x2b   : > { %p1157_p2 = pnand %p779_p0, %p1134_p12  ;;  %s190_s10 = scalar_lea.sflag [#allocation3], %s189_s21 }
  0x2c   : > { %s915_s14 = scalar_lea.vmem %s203_s9, 256  ;;  %s1019_s11 = smov [#allocation2]  }
  0x2d   : > { %p904_p3 = pneg %p1157_p2  ;;  %p916_p5 = scmp.ne.s32.totalorder %s203_s9, %s915_s14 }
  0x2e   : > { %s920_s3 = sshll.u32 %s1019_s11, 4  ;;  %s921_s3 = int_to_ptr.vmem [resolvable:$false] %s920_s3 }
  0x2f   : > { %p918_p7 = pnand %p916_p5, %p904_p3  ;;  %s922_s29 = scalar_lea.vmem %s921_s3, 512 }
  0x30   : > { %p923_p4 = scmp.lt.s32.totalorder %s203_s9, %s921_s3  ;;  %p924_p9 = scmp.lt.s32.totalorder %s922_s29, %s915_s14 }
  0x31   : > { %p919_p6 = pneg %p918_p7 }
  0x32   : > { %p925_p11 = por %p924_p9, %p923_p4 }
  0x34   : > { %p926_p10 = pnand %p925_p11, %p919_p6 }
  0x36   : > { %929 = shalt.err (!%p926_p10)
}
  0x37   : > { %s1020_s12 = smov 128   ;;  %s1021_s22 = smov 8  }
  0x38   : > { %773 = dma.hbm_to_vmem [thread:$0]  (!%p1157_p2), %s201_s7, 256, %s203_s9, %s190_s10, %s1020_s12, %s1020_s12, %s1021_s22  }
  0x39   : > { %214 = sbr.rel (%p1107_p8) target bundleno = 593 (0x251), region = 36  ;;  %s1168_s21 = sand.u32 (!%p1107_p8), 1, %s998_s16  }
  0x3a   : > { %s687_s30 = sshll.u32 (!%p1107_p8), %s1168_s21, 4  ;;  %s217_s3 = scalar_lea.sflag (!%p1107_p8), [#allocation3], %s1168_s21 }
  0x3b   : > { %s220_s6 = scalar_lea.vmem (!%p1107_p8), [#allocation2], %s687_s30  ;;  %p1277_p12 = scmp.ne.s32.totalorder (!%p1107_p8), %s1269_s25, 0 }
  0x3e   : > { %981 = dma.done.wait (%p1277_p12), %s217_s3, 256  }
  0x3f   : > { %983 = vsyncadd (%p1277_p12), %s217_s3, 4294967040 }
  0x40   : > { %985 = dma.done.wait (%p1087_p1), [#allocation6], 3072  }
  0x41   : > { %987 = vsyncadd (%p1087_p1), [#allocation6], 4294964224  ;;  %v252_v0 = vld [vmem:[%s220_s6] sm:$0xff]  ;;  %v253_v1 = vld [vmem:[%s220_s6 + $0x8] sm:$0xff]  ;;  %v1022_v4 = vmov 0.0   ;;  %v1023_v27 = vmov 0  }
  0x42   : > { %256 = vadd.xlane.f32.xlu0 %v252_v0  ;;  %v840_v2 = vld [vmem:[#allocation5 + $0xac] ss:$12 sps:$4 sm:$0xff]   ;;  %v842_v3 = vld [vmem:[#allocation5 + $0xa8] ss:$12 sps:$4 sm:$0xff]   ;;  %736 = vmatprep.subr.bf16.mxu1 %v1022_v4  ;;  %v843_v5 = vld [vmem:[#allocation5 + $0xb0] ss:$12 sps:$4 sm:$0xff]  }
  0x43   : > { %456 = vmatprep.subr.bf16.mxu0 %v840_v2  ;;  %737 = vmatpush3.bf16.msra.mxu1 %v843_v5  ;;  %v844_v14 = vld [vmem:[#allocation5 + $0x94] ss:$12 sps:$4 sm:$0xff]   ;;  %v846_v15 = vld [vmem:[#allocation5 + $0x90] ss:$12 sps:$4 sm:$0xff]   ;;  %v847_v16 = vld [vmem:[#allocation5 + $0x98] ss:$12 sps:$4 sm:$0xff]  }
  0x44   : > { %457 = vmatpush1.bf16.msra.mxu0 %v842_v3  ;;  %738 = vmatprep.subr.bf16.mxu1 %v1022_v4  ;;  %v848_v17 = vld [vmem:[#allocation5 + $0x7c] ss:$12 sps:$4 sm:$0xff]   ;;  %v850_v18 = vld [vmem:[#allocation5 + $0x78] ss:$12 sps:$4 sm:$0xff]   ;;  %v851_v19 = vld [vmem:[#allocation5 + $0x80] ss:$12 sps:$4 sm:$0xff]  }
  0x45   : > { %458 = vmatprep.subr.bf16.mxu0 %v844_v14  ;;  %v852_v20 = vld [vmem:[#allocation5 + $0x64] ss:$12 sps:$4 sm:$0xff]   ;;  %v854_v21 = vld [vmem:[#allocation5 + $0x60] ss:$12 sps:$4 sm:$0xff]   ;;  %v855_v22 = vld [vmem:[#allocation5 + $0x68] ss:$12 sps:$4 sm:$0xff]   ;;  %488 = vmatprep.mubr.bf16.mxu0 %v1023_v27 }
  0x46   : > { %258 = vadd.xlane.f32.xlu0 %v253_v1  ;;  %v856_v23 = vld [vmem:[#allocation5 + $0x4c] ss:$12 sps:$4 sm:$0xff]   ;;  %v858_v24 = vld [vmem:[#allocation5 + $0x48] ss:$12 sps:$4 sm:$0xff]   ;;  %v859_v25 = vld [vmem:[#allocation5 + $0x50] ss:$12 sps:$4 sm:$0xff]  }
  0x47   : > { %739 = vmatpush3.bf16.msra.mxu1 %v847_v16  ;;  %v860_v26 = vld [vmem:[#allocation5 + $0x34] ss:$12 sps:$4 sm:$0xff]   ;;  %vm1024_vm0 = vmmov 0   ;;  %v862_v28 = vld [vmem:[#allocation5 + $0x30] ss:$12 sps:$4 sm:$0xff]   ;;  %s756_s8 = smul.u32 24, %s1168_s21 }
  0x48   : > { %459 = vmatpush1.bf16.msra.mxu0 %v846_v15  ;;  %740 = vmatprep.subr.bf16.mxu1 %v1022_v4  ;;  %v863_v29 = vld [vmem:[#allocation5 + $0x38] ss:$12 sps:$4 sm:$0xff]   ;;  %v864_v30 = vld [vmem:[#allocation5 + $0x1c] ss:$12 sps:$4 sm:$0xff]   ;;  %v867_v32 = vld [vmem:[#allocation5 + $0x20] ss:$12 sps:$4 sm:$0xff]  }
  0x49   : > { %460 = vmatprep.subr.bf16.mxu0 %v848_v17  ;;  %752 = vmatprep.mubr.msk.bf16.mxu1 %vm1024_vm0, %v1022_v4  ;;  %v866_v31 = vld [vmem:[#allocation5 + $0x18] ss:$12 sps:$4 sm:$0xff]   ;;  %v870_v34 = vld [vmem:[#allocation5] ss:$12 sps:$4 sm:$0xff]   ;;  %v871_v35 = vld [vmem:[#allocation5 + $0x8] ss:$12 sps:$4 sm:$0xff]  }
  0x4a   : > { %v868_v33 = vld [vmem:[#allocation5 + $0x4] ss:$12 sps:$4 sm:$0xff]   ;;  %v689_v44 = vld [vmem:[%s1261_s1] ss:$0 sm:$0xff]  ;;  %s248_s9 = scalar_lea.vmem [#allocation7], %s756_s8  ;;  %s757_s10 = smul.u32 384, %s1006_s18 }
  0x4b   : > { %741 = vmatpush3.bf16.msra.mxu1 %v851_v19  ;;  %v690_v48 = vld [vmem:[%s1262_s2] ss:$0 sm:$0xff]  ;;  %s581_s24 = sshll.u32 %s248_s9, 4  ;;  %s565_s18 = scalar_lea.sflag [#allocation4], %s1168_s21  ;;  %s1207_s24 = int_to_ptr.vmem [resolvable:$true] %s581_s24 }
  0x4c   : > { %461 = vmatpush1.bf16.msra.mxu0 %v850_v18  ;;  %742 = vmatprep.subr.bf16.mxu1 %v1022_v4  ;;  %s1212_s29 = scalar_lea.hbm %s1264_s4, %s757_s10  ;;  %s930_s12 = scalar_lea.vmem %s1207_s24, 384 }
  0x4d   : > { %462 = vmatprep.subr.bf16.mxu0 %v852_v20  ;;  %p931_p1 = scmp.ne.s32.totalorder %s1207_s24, %s930_s12  ;;  %s1025_s22 = smov [#allocation7]  }
  0x4e   : > { %s934_s30 = sshll.u32 %s1025_s22, 4  ;;  %s935_s30 = int_to_ptr.vmem [resolvable:$false] %s934_s30 }
  0x4f   : > { %743 = vmatpush3.bf16.msra.mxu1 %v855_v22  ;;  %p932_p8 = pnand %p931_p1, %p1140_p13  ;;  %s936_s3 = scalar_lea.vmem %s935_s30, 768 }
  0x50   : > { %463 = vmatpush1.bf16.msra.mxu0 %v854_v21  ;;  %744 = vmatprep.subr.bf16.mxu1 %v1022_v4  ;;  %p937_p0 = scmp.lt.s32.totalorder %s1207_s24, %s935_s30  ;;  %p938_p2 = scmp.lt.s32.totalorder %s936_s3, %s930_s12 }
  0x51   : > { %464 = vmatprep.subr.bf16.mxu0 %v856_v23  ;;  %p933_p10 = pneg %p932_p8 }
  0x52   : > { %p939_p3 = por %p938_p2, %p937_p0 }
  0x53   : > { %745 = vmatpush3.bf16.msra.mxu1 %v859_v25 }
  0x54   : > { %465 = vmatpush1.bf16.msra.mxu0 %v858_v24  ;;  %746 = vmatprep.subr.bf16.mxu1 %v1022_v4  ;;  %p940_p5 = pnand %p939_p3, %p933_p10 }
  0x55   : > { %466 = vmatprep.subr.bf16.mxu0 %v860_v26 }
  0x57   : > { %747 = vmatpush3.bf16.msra.mxu1 %v863_v29 }
  0x58   : > { %467 = vmatpush1.bf16.msra.mxu0 %v862_v28  ;;  %748 = vmatprep.subr.bf16.mxu1 %v1022_v4 }
  0x59   : > { %468 = vmatprep.subr.bf16.mxu0 %v864_v30 }
  0x5b   : > { %749 = vmatpush3.bf16.msra.mxu1 %v867_v32 }
  0x5c   : > { %469 = vmatpush1.bf16.msra.mxu0 %v866_v31  ;;  %750 = vmatprep.subr.bf16.mxu1 %v1022_v4 }
  0x5d   : > { %470 = vmatprep.subr.bf16.mxu0 %v868_v33 }
  0x5f   : > { %751 = vmatpush3.bf16.msra.mxu1 %v871_v35 }
  0x60   : > { %471 = vmatpush1.bf16.msra.mxu0 %v870_v34 }
  0xcb   : > { %v257_v6 = vpop.xlane.xlu0 %256 }
  0xcc   : > { %v261_v7 = vmul.f32 0.0078125, %v257_v6 }
  0xce   : > { %v1182_v8 = vsub.f32 %v252_v0, %v261_v7 }
  0xcf   : > { %v259_v9 = vpop.xlane.xlu0 %258 }
  0xd0   : > { %v262_v10 = vmul.f32 0.0078125, %v259_v9  ;;  %v265_v11 = vmul.f32 %v1182_v8, %v1182_v8 }
  0xd2   : > { %v1186_v12 = vsub.f32 %v253_v1, %v262_v10  ;;  %267 = vadd.xlane.f32.xlu1 %v265_v11 }
  0xd4   : > { %v266_v13 = vmul.f32 %v1186_v12, %v1186_v12 }
  0xd6   : > { %269 = vadd.xlane.f32.xlu1 %v266_v13 }
 0x15b   : > { %v268_v36 = vpop.xlane.xlu1 %267 }
 0x15c   : > { %v271_v37 = vmul.f32 0.0078125, %v268_v36 }
 0x15e   : > { %v273_v38 = vadd.f32 1e-05, %v271_v37 }
 0x15f   : > { %v270_v39 = vpop.xlane.xlu1 %269 }
 0x160   : > { %872 = vrsqrt.f32 %v273_v38  ;;  %v272_v40 = vmul.f32 0.0078125, %v270_v39 }
 0x162   : > { %v274_v41 = vadd.f32 1e-05, %v272_v40 }
 0x164   : > { %874 = vrsqrt.f32 %v274_v41 }
 0x16d   : > { %v873_v42 = vpop.eup %872 }
 0x16e   : > { %v277_v43 = vmul.f32 %v873_v42, %v1182_v8 }
 0x170   : > { %v285_v47 = vmul.f32 %v689_v44, %v277_v43 }
 0x171   : > { %v875_v45 = vpop.eup %874 }
 0x172   : > { %v278_v46 = vmul.f32 %v875_v45, %v1186_v12  ;;  %v293_v50 = vadd.f32 %v690_v48, %v285_v47 }
 0x174   : > { %v286_v49 = vmul.f32 %v689_v44, %v278_v46 }
 0x176   : > { %v294_v51 = vadd.f32 %v690_v48, %v286_v49 }
 0x178   : > { %v295_v52 = vpack.c.bf16 %v294_v51, %v293_v50 }
 0x17a   : > { %489 = vmatmul.mubr.bf16.vlgmr.msra.gmra.mxu0 %v295_v52  ;;  %753 = vmatmul.mubr.bf16.vlgmr.msra.gmra.mxu1 %v295_v52 }
 0x23a   : > { %v490_v53 = vpop.f32.mrf.mxu0  ;;  %v533_v54 = vpop.f32.mrf.mxu1 }
 0x23b   : > { %v724_v55 = vpack.c.bf16 %v533_v54, %v533_v54 }
 0x23c   : > { %v492_v56 = vpop.f32.mrf.mxu0  ;;  %v754_v57 = vpop.f32.mrf.mxu1 }
 0x23d   : > { %561 = vst [vmem:[%s248_s9 + $0x8] sm:$0xf] %v724_v55  ;;  %v723_v58 = vpack.c.bf16 %v492_v56, %v490_v53 }
 0x23e   : > { %v494_v59 = vpop.f32.mrf.mxu0  ;;  %v536_v60 = vpop.f32.mrf.mxu1 }
 0x23f   : > { %560 = vst [vmem:[%s248_s9] sm:$0xff] %v723_v58  ;;  %v726_v61 = vpack.c.bf16 %v536_v60, %v536_v60 }
 0x240   : > { %v496_v62 = vpop.f32.mrf.mxu0  ;;  %v755_v63 = vpop.f32.mrf.mxu1 }
 0x241   : > { %563 = vst [vmem:[%s248_s9 + $0x14] sm:$0xf] %v726_v61  ;;  %v725_v0 = vpack.c.bf16 %v496_v62, %v494_v59 }
 0x243   : > { %562 = vst [vmem:[%s248_s9 + $0xc] sm:$0xff] %v725_v0 }
 0x244   : > { %943 = shalt.err (!%p940_p5)
}
 0x245   : > { %s944_s6 = scalar_lea.hbm %s1212_s29, 384  ;;  %s948_s27 = scalar_lea.hbm %s1264_s4, 768 }
 0x246   : > { %p945_p7 = scmp.ne.s32.totalorder %s1212_s29, %s944_s6  ;;  %p949_p9 = scmp.lt.s32.totalorder %s1212_s29, %s1264_s4 }
 0x247   : > { %p950_p11 = scmp.lt.s32.totalorder %s948_s27, %s944_s6 }
 0x248   : > { %p946_p6 = pnand %p945_p7, %p1140_p13 }
 0x249   : > { %p951_p12 = por %p950_p11, %p949_p9 }
 0x24a   : > { %p947_p4 = pneg %p946_p6 }
 0x24c   : > { %p952_p1 = pnand %p951_p12, %p947_p4 }
 0x24e   : > { %955 = shalt.err (!%p952_p1)
}
 0x24f   : > { %s1026_s9 = smov 192   ;;  %s1027_s10 = smov 12  }
 0x250   : > { %764 = dma.vmem_to_hbm [thread:$0]  (%p1140_p13), %s1207_s24, 384, %s1212_s29, %s565_s18, %s1026_s9, %s1026_s9, %s1027_s10  }
 0x251 PF: > { %s596_s14 = sand.u32 1, %s994_s15   ;;  %p1278_p8 = scmp.ne.s32.totalorder %s1270_s26, 0 }
 0x252   : > { %p1279_p10 = scmp.ge.s32.totalorder %s1014_s20, 2  ;;  %s597_s11 = scalar_lea.sflag [#allocation4], %s596_s14 }
 0x254   : > { %p775_p0 = pnand %p1279_p10, %p1278_p8 }
 0x256   : > { %p776_p2 = pneg %p775_p0 }
 0x258   : > { %989 = dma.done.wait (%p776_p2), %s597_s11, 384  }
 0x259   : > { %991 = vsyncadd (%p776_p2), %s597_s11, 4294966912  ;;  %s21_s20 = sadd.s32 1, %s1014_s20   ;;  %s1280_s15 = smov %s998_s16 }
 0x25a   : > { %p18_p3 = scmp.ge.s32.totalorder %s21_s20, 4   ;;  %s1281_s16 = smov %s1002_s17 }
 0x25b   : > { %s1282_s17 = smov %s1149_s28  ;;  %s1283_s18 = smov %s1010_s19 }
 0x25c   : > { %s1284_s19 = smov %s1286_s5  ;;  %20 = sbr.rel (!%p18_p3) target bundleno = 9 (0x9), region = 85 }
 0x261   :  { %602 = vsyncpa [#allocation3], 1 }
 0x262   :  { %604 = vsyncpa [#allocation3 + $0x1], 1 }
 0x263   :  { %605 = vsyncpa [#allocation6], 1 }
 0x264   :  { %606 = vsyncpa [#allocation4], 1 }
 0x265   :  { %608 = vsyncpa [#allocation4 + $0x1], 1 }

</bundles_post_ra>
